<compile_context>
chip_gen: v7x
topology: tpu7x:2x2x1
jax: 0.10.0
libtpu: 0.0.40
codegen_flags: <defaults>
</compile_context>

<pallas_src>
import functools

import jax
import jax.numpy as jnp
from jax import lax
from jax.experimental import pallas as pl
from jax.experimental.pallas import tpu as pltpu


def _round_up(x: int, m: int) -> int:
    return ((x + m - 1) // m) * m


def _masked_conv1d_kernel(
    lens_ref,   # SMEM (B,) int32  -- scalar prefetch
    x_ref,      # VMEM (1, 1, C_in, L) compute dtype; L = stride * phase_width
    w_ref,      # VMEM fold: (C_out, K*C_in) | tap: (K, C_out, C_in)
    o_ref,      # VMEM (1, C_out, T_TILE)
    *,
    pad_left: int,
    stride: int,
    dilation: int,
    kernel_size: int,
    phase_width: int,
    fold_taps: bool,
):
    b = pl.program_id(0)
    tt = pl.program_id(1)
    seq_len = lens_ref[b]

    x = x_ref[0, 0]                       # (C_in, L)
    _, l_len = x.shape
    c_out = o_ref.shape[1]
    t_tile = o_ref.shape[2]

    # Time mask built from a slim (1, L) iota; broadcast over channels in the select.
    # Column p*phase_width + j of the framed window holds padded-time position
    #   tile_start + j*stride + p  (tile_start = tt * t_tile * stride).
    col = lax.broadcasted_iota(jnp.int32, (1, l_len), 1)
    if stride == 1:
        pos = tt * t_tile + col
    else:
        pos = tt * (t_tile * stride) + (col % phase_width) * stride + (col // phase_width)
    # valid iff (padded_pos - pad_left) < lens[b]; padding columns are zero anyway.
    mask = (pos - pad_left) < seq_len
    xm = jnp.where(mask, x, jnp.zeros_like(x))

    def tap(k):
        # tap k starts at phase p=(k*d)%stride, in-phase offset q=(k*d)//stride
        off = ((k * dilation) % stride) * phase_width + (k * dilation) // stride
        return xm[:, off:off + t_tile]    # contiguous lane slice, (C_in, T_TILE)

    if fold_taps:
        # Fold the K taps into one deep MXU contraction: (C_out, K*C_in) @ (K*C_in, T_TILE).
        xstack = jnp.concatenate([tap(k) for k in range(kernel_size)], axis=0)
        out = jnp.dot(w_ref[...], xstack, preferred_element_type=jnp.float32)
    else:
        # TODO(synk): for very large kernel_size, switch to lax.fori_loop(unroll=...)
        #             to bound vreg live ranges instead of a fully unrolled Python loop.
        out = jnp.zeros((c_out, t_tile), jnp.float32)
        for k in range(kernel_size):
            out = out + jnp.dot(w_ref[k], tap(k), preferred_element_type=jnp.float32)

    o_ref[0] = out.astype(o_ref.dtype)


def masked_conv1d(
    x: jax.Array,        # (B, C_in, T)
    lens: jax.Array,     # (B,) int
    weight: jax.Array,   # (C_out, C_in, K)
    *,
    stride: int = 1,
    padding=0,           # int or (pad_left, pad_right)
    dilation: int = 1,
    compute_dtype=jnp.bfloat16,
):
    """Forward pass of MaskedConv1d (use_mask=True, heads=-1, groups=1, bias=False)."""
    B, C_in, T = x.shape
    C_out, C_in_w, K = weight.shape
    assert C_in == C_in_w
    # TODO(synk): groups != 1 / heads != -1 (depthwise) variants of MaskedConv1d are not implemented.

    if isinstance(padding, (tuple, list)):
        pad_l, pad_r = int(padding[0]), int(padding[1])
    else:
        pad_l = pad_r = int(padding)

    T_pad = T + pad_l + pad_r
    T_out = (T_pad - dilation * (K - 1) - 1) // stride + 1

    # get_seq_len() (integer glue, matches torch rounding_mode='trunc' for non-negative lens)
    same_padding = (stride == 1) and (pad_l + pad_r == dilation * (K - 1))
    if same_padding:
        lens_out = lens
    else:
        lens_out = (lens + (pad_l + pad_r) - dilation * (K - 1) - 1) // stride + 1

    out_dtype = x.dtype
    c_item = jnp.dtype(compute_dtype).itemsize
    o_item = jnp.dtype(out_dtype).itemsize

    # ---- pick a lane-dense time tile (multiple of 128) under a conservative VMEM budget ----
    q_max = (dilation * (K - 1)) // stride
    w_bytes = C_out * C_in * K * c_item

    def tile_bytes(t):
        in_b = stride * C_in * (t + q_max) * c_item     # framed input window
        out_b = C_out * t * o_item
        return 2 * (in_b + out_b) + 2 * w_bytes          # double-buffered tiles + weight

    budget = 16 * 2**20                                  # conservative: fits v5e/v6e/v7x
    t_tile = min(_round_up(max(T_out, 1), 128), 2048)
    while t_tile > 128 and tile_bytes(t_tile) > budget:
        t_tile -= 128
    n_t = pl.cdiv(T_out, t_tile)
    T_out_pad = n_t * t_tile
    Wp = t_tile + q_max           # per-stride-phase window width
    L = stride * Wp               # framed window width per tile

    # ---- wrapper-side layout plumbing (cast, pad, frame) ----
    x_c = x.astype(compute_dtype)
    x_p = jnp.pad(x_c, ((0, 0), (0, 0), (pad_l, pad_r)))
    need = (n_t - 1) * t_tile * stride + (Wp - 1) * stride + (stride - 1) + 1
    if need > T_pad:
        x_p = jnp.pad(x_p, ((0, 0), (0, 0), (0, need - T_pad)))

    # x_win[b, t, c, p*Wp + j] = x_p[b, c, t*t_tile*stride + j*stride + p]
    idx = (jnp.arange(n_t)[:, None, None] * (t_tile * stride)
           + jnp.arange(stride)[None, :, None]
           + jnp.arange(Wp)[None, None, :] * stride).reshape(n_t, L)
    x_win = jnp.transpose(x_p[:, :, idx], (0, 2, 1, 3))   # (B, n_t, C_in, L)

    fold_taps = (C_in < 128) and (K * C_in <= 1024)
    if fold_taps:
        # (C_out, K*C_in), row-major over (k, c) to match the in-kernel tap stack.
        w_prep = jnp.transpose(weight, (0, 2, 1)).reshape(C_out, K * C_in).astype(compute_dtype)
        w_spec = pl.BlockSpec((C_out, K * C_in), lambda b, t, lens_ref: (0, 0))
    else:
        w_prep = jnp.transpose(weight, (2, 0, 1)).astype(compute_dtype)   # (K, C_out, C_in)
        w_spec = pl.BlockSpec((K, C_out, C_in), lambda b, t, lens_ref: (0, 0, 0))

    kernel = functools.partial(
        _masked_conv1d_kernel,
        pad_left=pad_l, stride=stride, dilation=dilation,
        kernel_size=K, phase_width=Wp, fold_taps=fold_taps,
    )

    vmem_limit = int(min(max(3 * tile_bytes(t_tile), 32 * 2**20), 56 * 2**20))

    out_padded = pl.pallas_call(
        kernel,
        out_shape=jax.ShapeDtypeStruct((B, C_out, T_out_pad), out_dtype),
        grid_spec=pltpu.PrefetchScalarGridSpec(
            num_scalar_prefetch=1,
            grid=(B, n_t),
            in_specs=[
                pl.BlockSpec((1, 1, C_in, L), lambda b, t, lens_ref: (b, t, 0, 0)),
                w_spec,
            ],
            out_specs=pl.BlockSpec((1, C_out, t_tile), lambda b, t, lens_ref: (b, 0, t)),
        ),
        compiler_params=pltpu.CompilerParams(
            dimension_semantics=("parallel", "parallel"),
            vmem_limit_bytes=vmem_limit,
        ),
    )(lens.astype(jnp.int32), x_win, w_prep)

    return out_padded[:, :, :T_out], lens_out


def _reference(x, lens, weight, *, stride, padding, dilation):
    """Pure-JAX reference of the torch forward (for correctness check)."""
    B, C_in, T = x.shape
    K = weight.shape[-1]
    t_idx = jnp.arange(T)[None, :]
    mask = (t_idx < lens[:, None]).astype(x.dtype)
    xm = x * mask[:, None, :]
    out = lax.conv_general_dilated(
        xm, weight,
        window_strides=(stride,),
        padding=[(padding, padding)],
        rhs_dilation=(dilation,),
        dimension_numbers=("NCH", "OIH", "NCH"),
    )
    same_padding = (stride == 1) and (2 * padding == dilation * (K - 1))
    if same_padding:
        lens_out = lens
    else:
        lens_out = (lens + 2 * padding - dilation * (K - 1) - 1) // stride + 1
    return out, lens_out


if __name__ == "__main__":
    # MaskedConv1d(in_channels=4, out_channels=8, kernel_size=3, padding=1,
    #              stride=1, dilation=1, groups=1, heads=-1, bias=False, use_mask=True)
    B, C_in, C_out, T, K = 2, 4, 8, 16, 3
    stride, padding, dilation = 1, 1, 1

    key = jax.random.PRNGKey(0)
    kx, kw = jax.random.split(key)
    x = jax.random.normal(kx, (B, C_in, T), dtype=jnp.float32)
    fan_in = C_in * K
    weight = jax.random.normal(kw, (C_out, C_in, K), dtype=jnp.float32) * (1.0 / fan_in) ** 0.5
    lens = jnp.array([16, 9], dtype=jnp.int32)

    ref_out, ref_lens = _reference(x, lens, weight, stride=stride, padding=padding, dilation=dilation)

    # f32 compute path (tight check against the reference)
    out32, lens32 = masked_conv1d(x, lens, weight, stride=stride, padding=padding,
                                  dilation=dilation, compute_dtype=jnp.float32)
    out32 = jax.block_until_ready(out32)
    assert out32.shape == ref_out.shape, (out32.shape, ref_out.shape)
    assert jnp.allclose(out32, ref_out, atol=1e-4, rtol=1e-4)
    assert jnp.array_equal(lens32, ref_lens)

    # bf16 MXU path (default; f32 accumulation, looser tolerance vs the f32 reference)
    out16, lens16 = masked_conv1d(x, lens, weight, stride=stride, padding=padding, dilation=dilation)
    out16 = jax.block_until_ready(out16)
    assert out16.shape == ref_out.shape
    assert jnp.allclose(out16, ref_out, atol=5e-2, rtol=5e-2)
    assert jnp.array_equal(lens16, ref_lens)

    # strided / dilated config exercising the phase-decomposed framing
    out_s, lens_s = masked_conv1d(x, lens, weight, stride=2, padding=2, dilation=2,
                                  compute_dtype=jnp.float32)
    out_s = jax.block_until_ready(out_s)
    ref_s, ref_lens_s = _reference(x, lens, weight, stride=2, padding=2, dilation=2)
    assert out_s.shape == ref_s.shape, (out_s.shape, ref_s.shape)
    assert jnp.allclose(out_s, ref_s, atol=1e-4, rtol=1e-4)
    assert jnp.array_equal(lens_s, ref_lens_s)

    print("KERNEL_OK")
</pallas_src>

<mosaic_0001>
module attributes {stable_mosaic.version = 11 : i64} {
  func.func @_masked_conv1d_kernel(%arg0: i32, %arg1: i32, %arg2: memref<2xi32, #tpu.memory_space<smem>>, %arg3: memref<1x1x4x130xf32, #tpu.memory_space<vmem>>, %arg4: memref<8x12xf32, #tpu.memory_space<vmem>>, %arg5: memref<1x8x128xf32, #tpu.memory_space<vmem>>) attributes {dimension_semantics = [#tpu.dimension_semantics<parallel>, #tpu.dimension_semantics<parallel>], iteration_bounds = array<i64: 2, 1>, scalar_prefetch = 1 : i64, scratch_operands = 0 : i64, tpu.core_type = #tpu.core_type<tc>, window_params = [{transform_indices = @transform_0, window_bounds = array<i64: 1, 1, 4, 130>}, {pipeline_mode = #tpu.pipeline_mode<synchronous>, transform_indices = @transform_1, window_bounds = array<i64: 8, 12>}, {transform_indices = @transform_2, window_bounds = array<i64: 1, 8, 128>}]} {
    %0 = arith.index_cast %arg0 : i32 to index
    %1 = memref.load %arg2[%0] : memref<2xi32, #tpu.memory_space<smem>>
    %c0 = arith.constant 0 : index
    %c0_0 = arith.constant 0 : index
    %c0_1 = arith.constant 0 : index
    %c0_2 = arith.constant 0 : index
    %2 = vector.load %arg3[%c0, %c0_0, %c0_1, %c0_2] : memref<1x1x4x130xf32, #tpu.memory_space<vmem>>, vector<1x1x4x130xf32>
    %3 = vector.shape_cast %2 : vector<1x1x4x130xf32> to vector<4x130xf32>
    %4 = tpu.iota {dimensions = array<i32: 1>} : vector<1x130xi32>
    %c128_i32 = arith.constant 128 : i32
    %5 = arith.muli %arg1, %c128_i32 : i32
    %6 = vector.broadcast %5 : i32 to vector<1x130xi32>
    %7 = arith.addi %6, %4 : vector<1x130xi32>
    %c1_i32 = arith.constant 1 : i32
    %8 = vector.broadcast %c1_i32 : i32 to vector<1x130xi32>
    %9 = arith.subi %7, %8 : vector<1x130xi32>
    %10 = vector.broadcast %1 : i32 to vector<1x130xi32>
    %11 = arith.cmpi slt, %9, %10 : vector<1x130xi32>
    %cst = arith.constant 0.000000e+00 : f32
    %12 = vector.broadcast %cst : f32 to vector<4x130xf32>
    %13 = vector.shape_cast %11 : vector<1x130xi1> to vector<1x130xi1>
    %14 = vector.broadcast %13 : vector<1x130xi1> to vector<4x130xi1>
    %15 = arith.select %14, %3, %12 : vector<4x130xi1>, vector<4x130xf32>
    %16 = vector.extract_strided_slice %15 {offsets = [0, 0], sizes = [4, 128], strides = [1, 1]} : vector<4x130xf32> to vector<4x128xf32>
    %17 = vector.extract_strided_slice %15 {offsets = [0, 1], sizes = [4, 128], strides = [1, 1]} : vector<4x130xf32> to vector<4x128xf32>
    %18 = vector.extract_strided_slice %15 {offsets = [0, 2], sizes = [4, 128], strides = [1, 1]} : vector<4x130xf32> to vector<4x128xf32>
    %19 = tpu.concatenate %16, %17, %18 in 0 : vector<4x128xf32>, vector<4x128xf32>, vector<4x128xf32> -> vector<12x128xf32>
    %c0_3 = arith.constant 0 : index
    %c0_4 = arith.constant 0 : index
    %20 = vector.load %arg4[%c0_3, %c0_4] : memref<8x12xf32, #tpu.memory_space<vmem>>, vector<8x12xf32>
    %cst_5 = arith.constant dense<0.000000e+00> : vector<8x128xf32>
    %21 = tpu.matmul %20, %19, %cst_5 {dimension_numbers = #tpu.dot_dimension_numbers<[1], [0], [0], [1], [0, 0, 1, 1], [], []>} : vector<8x12xf32>, vector<12x128xf32>, vector<8x128xf32> -> vector<8x128xf32>
    %c0_6 = arith.constant 0 : index
    %c0_7 = arith.constant 0 : index
    %c0_8 = arith.constant 0 : index
    %22 = vector.load %arg5[%c0_6, %c0_7, %c0_8] : memref<1x8x128xf32, #tpu.memory_space<vmem>>, vector<1x8x128xf32>
    %23 = vector.shape_cast %22 : vector<1x8x128xf32> to vector<8x128xf32>
    %24 = vector.shape_cast %21 : vector<8x128xf32> to vector<1x8x128xf32>
    tpu.vector_store %arg5[%c0_6, %c0_7, %c0_8], %24 {strides = array<i32>} : memref<1x8x128xf32, #tpu.memory_space<vmem>>, vector<1x8x128xf32>,
    return
  }
  func.func @transform_0(%arg0: i32, %arg1: i32, %arg2: memref<2xi32, #tpu.memory_space<smem>>) -> (i32, i32, i32, i32) {
    %c0_i32 = arith.constant 0 : i32
    %c0_i32_0 = arith.constant 0 : i32
    %c0_i32_1 = arith.constant 0 : i32
    return %arg0, %arg1, %c0_i32, %c0_i32_0 : i32, i32, i32, i32
  }
  func.func @transform_1(%arg0: i32, %arg1: i32, %arg2: memref<2xi32, #tpu.memory_space<smem>>) -> (i32, i32) {
    %c0_i32 = arith.constant 0 : i32
    %c0_i32_0 = arith.constant 0 : i32
    %c0_i32_1 = arith.constant 0 : i32
    return %c0_i32, %c0_i32_0 : i32, i32
  }
  func.func @transform_2(%arg0: i32, %arg1: i32, %arg2: memref<2xi32, #tpu.memory_space<smem>>) -> (i32, i32, i32) {
    %c0_i32 = arith.constant 0 : i32
    %c0_i32_0 = arith.constant 0 : i32
    return %arg0, %c0_i32, %arg1 : i32, i32, i32
  }
}

</mosaic_0001>

<bundles_post_ra>
// kernel: tpu_custom_call.1
= control target key start
LH: loop header
LB: loop body
LE: loop exit
PB: predicated region body
PF: predicated region fallthrough
CT: control target
= control target key end

     0   :  { %s970_s0 = inlined_call_operand.hbm [shape: s32[2], index: 0, kind: input, shape index: {}]   ;;  %s971_s1 = inlined_call_operand.hbm [shape: f32[2,1,4,130], index: 1, kind: input, shape index: {}]   ;;  %s972_s2 = inlined_call_operand.hbm [shape: f32[8,12], index: 2, kind: input, shape index: {}]   ;;  %s973_s3 = inlined_call_operand.hbm [shape: f32[2,8,128], index: 3, kind: output, shape index: {}]  }
   0x1   :  { %s549_s14 = scalar_lea.hbm %s970_s0, 16 }
   0x2   :  { %p550_p0 = scmp.ne.s32.totalorder %s970_s0, %s549_s14  ;;  %p553_p1 = scmp.lt.u32.totalorder %s549_s14, %s970_s0 }
   0x4   :  { %p555_p2 = pnand %p553_p1, %p550_p0 }
   0x6   :  { %558 = shalt.err (!%p555_p2)  }
   0x7   :  { %s707_s19 = smov [#allocation3]  }
   0x8   :  { %9 = dma.hbm_to_smem %s970_s0, 16, %s707_s19, [#allocation2] }
   0x9   :  { %669 = dma.done.wait [#allocation2], 16 }
   0xa   :  { %670 = vsyncadd [#allocation2], 4294967280 }
   0xb   :  { %11 = sfence }
   0xc   :  { %12 = vsyncpa [#allocation5], 0 }
   0xd   :  { %14 = vsyncpa [#allocation5 + $0x1], 0 }
   0xe   :  { %15 = vsyncpa [#allocation8], 0 }
   0xf   :  { %16 = vsyncpa [#allocation6], 0 }
  0x10   :  { %18 = vsyncpa [#allocation6 + $0x1], 0  ;;  %s749_s22 = smov 0   ;;  %s751_s23 = smov 0  }
  0x11   :  { %s753_s24 = smov 0   ;;  %s755_s25 = smov 0  }
  0x12   :  { %s757_s26 = smov 0   ;;  %s759_s27 = smov 0  }
  0x13 LB: > { %s423_s0 = sadd.s32 4294967295, %s705_s27   ;;  %s424_s28 = sadd.s32 4294967294, %s705_s27   ;;  %s705_s27 = sphi %s759_s27, %s24_s27   ;;  %s701_s26 = sphi %s757_s26, %s998_s26   ;;  %s697_s25 = sphi %s755_s25, %s997_s25   ;;  %s693_s24 = sphi %s753_s24, %s996_s24   ;;  %s689_s23 = sphi %s751_s23, %s995_s23   ;;  %s685_s22 = sphi %s749_s22, %s994_s22  }
  0x14   : > { %p58_p3 = scmp.ne.s32.totalorder %s689_s23, %s685_s22  ;;  %p783_p4 = scmp.eq.s32.totalorder %s423_s0, 0 }
  0x15   : > { %p787_p5 = scmp.eq.s32.totalorder %s423_s0, 1  ;;  %p111_p6 = scmp.eq.s32.totalorder %s424_s28, 1 }
  0x16   : > { %s978_s29 = scalar_select %p783_p4, 1, 0 }
  0x17   : > { %s979_s30 = scalar_select %p787_p5, 1, 0 }
  0x18   : > { %p793_p7 = por %p783_p4, %p58_p3  ;;  %p425_p8 = scmp.ge.s32.totalorder %s705_s27, 1 }
  0x19   : > { %p798_p9 = por %p111_p6, %p58_p3  ;;  %p118_p10 = scmp.lt.s32.totalorder %s705_s27, 3 }
  0x1a   : > { %s980_s4 = scalar_select %p793_p7, 1, 0 }
  0x1b   : > { %s981_s5 = scalar_select %p798_p9, 1, 0 }
  0x1c   : > { %p803_p11 = pnand %p425_p8, %p118_p10  ;;  %s708_s7 = smov [#allocation7]  }
  0x1d   : > { %s131_s8 = sshll.u32 %s708_s7, 4  ;;  %s36_s10 = sadd.s32 1, %s701_s26  ;;  %s132_s8 = int_to_ptr.vmem [resolvable:$true] %s131_s8 }
  0x1e   : > { %s982_s6 = scalar_select %p803_p11, 1, 0 }
  0x1f   : > { %p466_p13 = pneg %p803_p11  ;;  %s45_s11 = sadd.s32 1, %s693_s24 }
  0x20   : > { %p818_p1 = scmp.ge.s32.totalorder %s36_s10, 2  ;;  %s559_s15 = scalar_lea.hbm %s972_s2, 128 }
  0x21   : > { %p812_p0 = pnand %p466_p13, %p783_p4  ;;  %p560_p2 = scmp.ne.s32.totalorder %s972_s2, %s559_s15 }
  0x22   : > { %s984_s12 = scalar_select %p818_p1, 1, 0 }
  0x23   : > { %p561_p3 = pneg %p812_p0  ;;  %p566_p10 = scmp.lt.u32.totalorder %s559_s15, %s972_s2 }
  0x25   : > { %p562_p6 = pnand %p561_p3, %p560_p2 }
  0x27   : > { %p563_p8 = pneg %p562_p6 }
  0x29   : > { %p568_p13 = pnand %p566_p10, %p563_p8 }
  0x2b   : > { %571 = shalt.err (!%p568_p13)
}
  0x2c   : > { %s572_s20 = scalar_lea.vmem %s132_s8, 128  ;;  %p580_p7 = scmp.lt.s32.totalorder %s132_s8, %s132_s8 }
  0x2d   : > { %p573_p12 = scmp.ne.s32.totalorder %s132_s8, %s572_s20  ;;  %p581_p11 = scmp.lt.s32.totalorder %s572_s20, %s572_s20 }
  0x2f   : > { %p575_p9 = pnand %p573_p12, %p561_p3  ;;  %p582_p5 = por %p581_p11, %p580_p7 }
  0x31   : > { %p576_p4 = pneg %p575_p9 }
  0x33   : > { %p583_p1 = pnand %p582_p5, %p576_p4 }
  0x35   : > { %586 = shalt.err (!%p583_p1)
}
  0x36   : > { %469 = dma.hbm_to_vmem [thread:$0]  (!%p812_p0), %s972_s2, 128, %s132_s8, [#allocation8]  }
  0x37   : > { %p985_p7 = scmp.ne.s32.totalorder %s984_s12, 0  ;;  %p52_p4 = scmp.ne.s32.totalorder %s693_s24, %s689_s23 }
  0x38   : > { %p53_p5 = scmp.eq.s32.totalorder %s705_s27, 0  ;;  %p479_p9 = scmp.lt.s32.totalorder %s705_s27, 2 }
  0x39   : > { %s1000_s10 = smov (%p985_p7, %s36_s10), 0  ;;  %p986_p1 = scmp.ne.s32.totalorder %s979_s30, 0 }
  0x3a   : > { %s40_s28 = ssub.s32 %s701_s26, %s1000_s10  ;;  %p54_p12 = por %p53_p5, %p52_p4 }
  0x3b   : > { %p43_p11 = scmp.eq.s32.totalorder %s40_s28, 0  ;;  %p850_p2 = por %p986_p1, %p52_p4 }
  0x3c   : > { %s142_s9 = sand.u32 1, %s693_s24   ;;  %s443_s12 = sshll.u32 %s701_s26, 7 }
  0x3d   : > { %s858_s13 = scalar_select %p43_p11, %s693_s24, %s45_s11  }
  0x3e   : > { %s428_s8 = sshll.u32 %s142_s9, 3  ;;  %s864_s16 = scalar_lea.hbm %s971_s1, %s443_s12 }
  0x3f   : > { %s146_s30 = scalar_lea.vmem [#allocation4], %s428_s8  ;;  %p868_p0 = pnand %p479_p9, %p54_p12 }
  0x40   : > { %s156_s17 = sshll.u32 %s146_s30, 4  ;;  %s143_s11 = scalar_lea.sflag [#allocation5], %s142_s9  ;;  %s866_s17 = int_to_ptr.vmem [resolvable:$true] %s156_s17 }
  0x41   : > { %s587_s19 = scalar_lea.hbm %s864_s16, 128  ;;  %p589_p6 = pneg %p868_p0 }
  0x42   : > { %p588_p3 = scmp.ne.s32.totalorder %s864_s16, %s587_s19  ;;  %s592_s0 = scalar_lea.hbm %s971_s1, 256 }
  0x43   : > { %p593_p13 = scmp.lt.u32.totalorder %s864_s16, %s971_s1  ;;  %p594_p7 = scmp.lt.u32.totalorder %s592_s0, %s587_s19 }
  0x44   : > { %p590_p8 = pnand %p589_p6, %p588_p3  ;;  %p596_p5 = scmp.lt.u32.totalorder %s587_s19, %s864_s16 }
  0x45   : > { %p595_p4 = por %p594_p7, %p593_p13 }
  0x46   : > { %p591_p10 = pneg %p590_p8 }
  0x47   : > { %p597_p9 = por %p596_p5, %p595_p4 }
  0x49   : > { %p598_p11 = pnand %p597_p9, %p591_p10 }
  0x4b   : > { %601 = shalt.err (!%p598_p11)
}
  0x4c   : > { %s602_s9 = scalar_lea.vmem %s866_s17, 128  ;;  %s709_s12 = smov [#allocation4]  }
  0x4d   : > { %p603_p12 = scmp.ne.s32.totalorder %s866_s17, %s602_s9  ;;  %s607_s14 = sshll.u32 %s709_s12, 4  ;;  %s608_s14 = int_to_ptr.vmem [resolvable:$false] %s607_s14 }
  0x4e   : > { %s609_s15 = scalar_lea.vmem %s608_s14, 256  ;;  %p610_p8 = scmp.lt.s32.totalorder %s866_s17, %s608_s14 }
  0x4f   : > { %p605_p1 = pnand %p603_p12, %p589_p6  ;;  %p611_p13 = scmp.lt.s32.totalorder %s609_s15, %s602_s9 }
  0x51   : > { %p606_p3 = pneg %p605_p1  ;;  %p612_p7 = por %p611_p13, %p610_p8 }
  0x53   : > { %p613_p4 = pnand %p612_p7, %p606_p3 }
  0x55   : > { %616 = shalt.err (!%p613_p4)
}
  0x56   : > { %473 = dma.hbm_to_vmem [thread:$0]  (!%p868_p0), %s864_s16, 128, %s866_s17, %s143_s11  }
  0x57   : > { %p989_p10 = scmp.ne.s32.totalorder %s982_s6, 0 }
  0x58   : > { %s900_s30 = sand.u32 (!%p989_p10), 1, %s689_s23   ;;  %p990_p6 = scmp.ne.s32.totalorder (!%p989_p10), %s980_s4, 0 }
  0x59   : > { %165 = sbr.rel (%p989_p10) target bundleno = 467 (0x1d3), region = 28  ;;  %s432_s19 = sshll.u32 (!%p989_p10), %s900_s30, 3 }
  0x5a   : > { %s168_s20 = scalar_lea.sflag (!%p989_p10), [#allocation5], %s900_s30  ;;  %s171_s21 = scalar_lea.vmem (!%p989_p10), [#allocation4], %s432_s19 }
  0x60   : > { %672 = dma.done.wait (%p990_p6), %s168_s20, 128  }
  0x61   : > { %674 = vsyncadd (%p990_p6), %s168_s20, 4294967168  ;;  %p991_p0 = scmp.ne.s32.totalorder %s978_s29, 0 }
  0x63   : > { %676 = dma.done.wait (%p991_p0), [#allocation8], 128  }
  0x64   : > { %678 = vsyncadd (%p991_p0), [#allocation8], 4294967168  ;;  %v198_v0 = vlaneseq  ;;  %s196_s6 = sld [smem:[#allocation3 + %s697_s25]]  ;;  %v197_v5 = vld [vmem:[%s171_s21] sm:$0xff]  ;;  %v710_v7 = vmov 0.0|0.0   ;;  %vm711_vm2 = vmmov 0  }
  0x65   : > { %454 = vmatprep.subr.bf16.mxu0 %v710_v7  ;;  %v215_v8 = vcombine.high %v197_v5, %v197_v5  ;;  %v712_v13 = vmov 0.0   ;;  %s713_s29 = smov 127   ;;  %s714_s4 = smov 126   ;;  %vm227_vm3 = vcmask 1039360   ;;  %vm234_vm4 = vcmask 1031168   ;;  %v238_v26 = vld [vmem:[#allocation7] sm:$0xff] }
  0x66   : > { %v199_v1 = vand.u32 127, %v198_v0  ;;  %451 = vmatprep.mubr.msk.f32.mxu0 %vm711_vm2, %v712_v13  ;;  %vm236_vm5 = vcmask 1043456   ;;  %vm715_vm6 = vmmov 1   ;;  %vm239_vm8 = vcmask 97280   ;;  %s195_s16 = scalar_lea.vmem [#allocation9], %s432_s19  ;;  %s440_s18 = sshll.u32 %s697_s25, 7 }
  0x67   : > { %vm456_vm7 = vmpackc.low %vm236_vm5, %vm715_vm6  ;;  %s331_s17 = sshll.u32 %s195_s16, 4  ;;  %s923_s28 = scalar_lea.hbm %s973_s3, %s440_s18  ;;  %s918_s17 = int_to_ptr.vmem [resolvable:$true] %s331_s17 }
  0x68   : > { %v200_v2 = vadd.s32 128, %v199_v1  ;;  %v435_v3 = vadd.s32 4294967295, %v199_v1  ;;  %s317_s8 = scalar_lea.sflag [#allocation6], %s900_s30  ;;  %s617_s9 = scalar_lea.vmem %s918_s17, 128 }
  0x69   : > { %p618_p5 = scmp.ne.s32.totalorder %s918_s17, %s617_s9  ;;  %s716_s25 = smov [#allocation9]  }
  0x6a   : > { %v436_v4 = vadd.s32 4294967295, %v200_v2  ;;  %v207_v6 = vstv %s196_s6  ;;  %s621_s12 = sshll.u32 %s716_s25, 4  ;;  %s622_s12 = int_to_ptr.vmem [resolvable:$false] %s621_s12 }
  0x6b   : > { %vm208_vm0 = vcmp.lt.s32.totalorder %v435_v3, %v207_v6  ;;  %p619_p9 = pnand %p618_p5, %p850_p2  ;;  %s623_s14 = scalar_lea.vmem %s622_s12, 256 }
  0x6c   : > { %vm209_vm1 = vcmp.lt.s32.totalorder %v436_v4, %v207_v6  ;;  %v217_v9 = vsel %vm208_vm0, %v197_v5, 0.0  ;;  %p624_p12 = scmp.lt.s32.totalorder %s918_s17, %s622_s12  ;;  %p625_p1 = scmp.lt.s32.totalorder %s623_s14, %s617_s9 }
  0x6d   : > { %v218_v10 = vsel %vm209_vm1, %v215_v8, 0.0  ;;  %v221_v11 = vrot.slane %v217_v9, 4  ;;  %p620_p11 = pneg %p619_p9 }
  0x6e   : > { %v222_v12 = vrot.slane %v218_v10, 4  ;;  %v543_v15 = vpack.i.bf16 %v218_v10, %v217_v9  ;;  %p626_p3 = por %p625_p1, %p624_p12 }
  0x70   : > { %v538_v14 = vpack.i.bf16 %v222_v12, %v221_v11  ;;  %p627_p8 = pnand %p626_p3, %p620_p11 }
  0x72   : > { %539 = vrot.lane.b32.xlu0 %v538_v14, %s713_s29 }
  0x76   : > { %544 = vrot.lane.b32.xlu0 %v543_v15, %s714_s4 }
  0xe4   : > { %v540_v16 = vpop.permute.xlu0 %539 }
  0xe5   : > { %v542_v17 = vunpack.i.h.bf16 %v540_v16  ;;  %v541_v18 = vunpack.i.l.bf16 %v540_v16 }
  0xe7   : > { %v228_v19 = vsel %vm227_vm3, %v541_v18, %v542_v17 }
  0xe8   : > { %v545_v20 = vpop.permute.xlu0 %544  ;;  %v237_v24 = vsel %vm236_vm5, %v217_v9, %v228_v19 }
  0xe9   : > { %v547_v21 = vunpack.i.h.bf16 %v545_v20  ;;  %v546_v22 = vunpack.i.l.bf16 %v545_v20 }
  0xeb   : > { %v235_v23 = vsel %vm234_vm4, %v546_v22, %v547_v21 }
  0xec   : > { %v455_v25 = vpack.c.bf16 %v235_v23, %v237_v24 }
  0xee   : > { %457 = vmatpush3.bf16.msk.msra.mxu0 %vm456_vm7, %v455_v25 }
  0xf1   : > { %452 = vmatmul.mubr.msk.f32.vlgmr.msra.gmra.mrb[0].mxu0 %vm239_vm8, %v238_v26 }
 0x1c4   : > { %v311_v27 = vpop.f32.mrb[0].mxu0 }
 0x1c5   : > { %315 = vst [vmem:[%s195_s16] sm:$0xff] %v311_v27  ;;  %v453_v28 = vpop.f32.mrb[1].mxu0 }
 0x1c6   : > { %630 = shalt.err (!%p627_p8)
}
 0x1c7   : > { %s631_s15 = scalar_lea.hbm %s923_s28, 128  ;;  %s635_s20 = scalar_lea.hbm %s973_s3, 256 }
 0x1c8   : > { %p632_p13 = scmp.ne.s32.totalorder %s923_s28, %s631_s15  ;;  %p636_p10 = scmp.lt.u32.totalorder %s923_s28, %s973_s3 }
 0x1c9   : > { %p637_p6 = scmp.lt.u32.totalorder %s635_s20, %s631_s15  ;;  %p639_p5 = scmp.lt.u32.totalorder %s631_s15, %s923_s28 }
 0x1ca   : > { %p633_p7 = pnand %p632_p13, %p850_p2 }
 0x1cb   : > { %p638_p0 = por %p637_p6, %p636_p10 }
 0x1cc   : > { %p634_p4 = pneg %p633_p7 }
 0x1cd   : > { %p640_p9 = por %p639_p5, %p638_p0 }
 0x1cf   : > { %p641_p11 = pnand %p640_p9, %p634_p4 }
 0x1d1   : > { %644 = shalt.err (!%p641_p11)
}
 0x1d2   : > { %464 = dma.vmem_to_hbm [thread:$0]  (%p850_p2), %s918_s17, 128, %s923_s28, %s317_s8  }
 0x1d3 PF: > { %s343_s29 = sand.u32 1, %s685_s22   ;;  %p992_p12 = scmp.ne.s32.totalorder %s981_s5, 0 }
 0x1d4   : > { %p993_p1 = scmp.ge.s32.totalorder %s705_s27, 2  ;;  %s344_s4 = scalar_lea.sflag [#allocation6], %s343_s29 }
 0x1d6   : > { %p475_p3 = pnand %p993_p1, %p992_p12 }
 0x1d8   : > { %680 = dma.done.wait (!%p475_p3), %s344_s4, 128  }
 0x1d9   : > { %682 = vsyncadd (!%p475_p3), %s344_s4, 4294967168  ;;  %s24_s27 = sadd.s32 1, %s705_s27   ;;  %s994_s22 = smov %s689_s23 }
 0x1da   : > { %p21_p8 = scmp.ge.s32.totalorder %s24_s27, 4   ;;  %s995_s23 = smov %s693_s24 }
 0x1db   : > { %s996_s24 = smov %s858_s13  ;;  %s997_s25 = smov %s701_s26 }
 0x1dc   : > { %s998_s26 = smov %s1000_s10  ;;  %23 = sbr.rel (!%p21_p8) target bundleno = 19 (0x13), region = 77 }
 0x1e3   :  { %349 = vsyncpa [#allocation5], 1 }
 0x1e4   :  { %351 = vsyncpa [#allocation5 + $0x1], 1 }
 0x1e5   :  { %352 = vsyncpa [#allocation8], 1 }
 0x1e6   :  { %353 = vsyncpa [#allocation6], 1 }
 0x1e7   :  { %355 = vsyncpa [#allocation6 + $0x1], 1 }

</bundles_post_ra>
